<compile_context>
chip_gen: v5e
topology: v5e:2x2
jax: 0.10.0
libtpu: 0.0.40
codegen_flags: <defaults>
</compile_context>

<pallas_src>
import functools

import jax
import jax.numpy as jnp
from jax import lax
from jax.experimental import pallas as pl
from jax.experimental.pallas import tpu as pltpu


def _tv_partials_kernel(x_ref, out_h_ref, out_w_ref, *, tb, n_valid, need_mask):
    """Per-block partial TV sums. x_ref block is (TB, H, W); math in f32."""

    def body(mask_planes):
        x = x_ref[...].astype(jnp.float32)
        if mask_planes:
            # Select (not multiply) so OOB-padded garbage (possibly NaN/Inf)
            # in the final partial block cannot leak into the accumulation.
            plane = pl.program_id(0) * tb + lax.broadcasted_iota(
                jnp.int32, x.shape, 0)
            x = jnp.where(plane < n_valid, x, 0.0)

        # Reduce dh fully before dw is materialized -> lower peak live VMEM.
        dh = x[:, 1:, :] - x[:, :-1, :]                  # (TB, H-1, W)
        h_part = jnp.sum(jnp.sum(dh * dh, axis=0))       # plane-axis adds, then one xlane reduce
        dw = x[:, :, 1:] - x[:, :, :-1]                  # (TB, H, W-1)
        w_part = jnp.sum(jnp.sum(dw * dw, axis=0))

        # Lane-dense (1, 8, 128) per-block output tiles; wrapper reads [i,0,0].
        out_h_ref[...] = jnp.full(out_h_ref.shape, h_part, dtype=jnp.float32)
        out_w_ref[...] = jnp.full(out_w_ref.shape, w_part, dtype=jnp.float32)

    if not need_mask:
        body(False)
    else:
        is_last = pl.program_id(0) == pl.num_programs(0) - 1

        @pl.when(jnp.logical_not(is_last))
        def _():
            body(False)          # hot path: no per-element mask work

        @pl.when(is_last)
        def _():
            body(True)           # only the ragged tail pays for the mask


def _pick_block(n, h, w, in_itemsize):
    """Choose TB (planes per block) and a vmem limit, generation-aware."""
    try:
        vmem_cap = int(pltpu.get_tpu_info().vmem_capacity_bytes)
    except Exception:  # conservative fallback (v7x per-TC VMEM)
        vmem_cap = 64 * 1024 * 1024

    # HBM block target in the DMA dtype: ~7 MiB on 128-MiB-VMEM parts
    # (v5e/v6e), ~3.5 MiB on 64-MiB parts (v7x).
    if vmem_cap > 96 * 1024 * 1024:
        target_in_bytes = 7 * 1024 * 1024
    else:
        target_in_bytes = 3 * 1024 * 1024 + 512 * 1024

    plane_in_bytes = h * w * in_itemsize
    plane_f32_bytes = h * w * 4
    # Per-plane VMEM cost: double-buffered input + ~3 block-sized f32
    # intermediates (cast / diff / squared-before-reduce, conservative).
    per_plane_vmem = 2 * plane_in_bytes + 3 * plane_f32_bytes
    vmem_budget = int(vmem_cap * 0.4)

    tb = max(1, target_in_bytes // plane_in_bytes)
    tb = min(tb, max(1, vmem_budget // per_plane_vmem))
    tb = int(max(1, min(tb, n)))
    if n >= 2:
        # Keep at least 2 grid steps so the "parallel" axis can span both
        # TensorCores on v7x (single-TC parts are unaffected).
        tb = min(tb, (n + 1) // 2)

    vmem_limit = int(min(vmem_cap - 8 * 1024 * 1024,
                         max(tb * per_plane_vmem + 4 * 1024 * 1024,
                             16 * 1024 * 1024)))
    return tb, vmem_limit


def tv_loss(x, tv_loss_weight=0.5):
    """TV loss matching the PyTorch TVLoss.forward semantics.

    x: (B, C, H, W) array (any float dtype; reduction done in float32).
    Returns a float32 scalar. Normalization matches the PyTorch module as
    written: count_h = (H-1)*W, count_w = H*(W-1), divided by batch B only.
    """
    b, c, h, w = x.shape
    n = b * c
    count_h = float((h - 1) * w)
    count_w = float(h * (w - 1))

    x_flat = x.reshape(n, h, w)  # contiguous reshape, no data movement

    tb, vmem_limit = _pick_block(n, h, w, jnp.dtype(x.dtype).itemsize)
    grid = pl.cdiv(n, tb)
    need_mask = (n % tb) != 0

    kernel = functools.partial(
        _tv_partials_kernel, tb=tb, n_valid=n, need_mask=need_mask)

    out_h, out_w = pl.pallas_call(
        kernel,
        out_shape=(jax.ShapeDtypeStruct((grid, 8, 128), jnp.float32),
                   jax.ShapeDtypeStruct((grid, 8, 128), jnp.float32)),
        grid_spec=pl.GridSpec(
            grid=(grid,),
            in_specs=[pl.BlockSpec((tb, h, w), lambda i: (i, 0, 0))],
            out_specs=(pl.BlockSpec((1, 8, 128), lambda i: (i, 0, 0)),
                       pl.BlockSpec((1, 8, 128), lambda i: (i, 0, 0))),
        ),
        compiler_params=pltpu.CompilerParams(
            dimension_semantics=("parallel",),
            vmem_limit_bytes=vmem_limit,
        ),
    )(x_flat)

    h_tv = jnp.sum(out_h[:, 0, 0])
    w_tv = jnp.sum(out_w[:, 0, 0])
    return tv_loss_weight * 2.0 * (h_tv / count_h + w_tv / count_w) / b


def tv_loss_reference(x, tv_loss_weight=0.5):
    b, _, h, w = x.shape
    count_h = (h - 1) * w
    count_w = h * (w - 1)
    xf = x.astype(jnp.float32)
    h_tv = jnp.sum((xf[:, :, 1:, :] - xf[:, :, : h - 1, :]) ** 2)
    w_tv = jnp.sum((xf[:, :, :, 1:] - xf[:, :, :, : w - 1]) ** 2)
    return tv_loss_weight * 2.0 * (h_tv / count_h + w_tv / count_w) / b


if __name__ == "__main__":
    key = jax.random.PRNGKey(0)
    x = jax.random.normal(key, (2, 4, 16, 16), dtype=jnp.float32)

    out = tv_loss(x, tv_loss_weight=0.5)
    out = jax.block_until_ready(out)

    ref = tv_loss_reference(x, tv_loss_weight=0.5)
    assert jnp.allclose(out, ref, rtol=1e-5, atol=1e-5), (out, ref)

    print("KERNEL_OK")
</pallas_src>

<mosaic_0001>
module attributes {stable_mosaic.version = 11 : i64} {
  func.func @_tv_partials_kernel(%arg0: i32, %arg1: memref<4x16x16xf32, #tpu.memory_space<vmem>>, %arg2: memref<1x8x128xf32, #tpu.memory_space<vmem>>, %arg3: memref<1x8x128xf32, #tpu.memory_space<vmem>>) attributes {dimension_semantics = [#tpu.dimension_semantics<parallel>], iteration_bounds = array<i64: 2>, scalar_prefetch = 0 : i64, scratch_operands = 0 : i64, tpu.core_type = #tpu.core_type<tc>, window_params = [{transform_indices = @transform_0, window_bounds = array<i64: 4, 16, 16>}, {transform_indices = @transform_1, window_bounds = array<i64: 1, 8, 128>}, {transform_indices = @transform_2, window_bounds = array<i64: 1, 8, 128>}]} {
    %c0 = arith.constant 0 : index
    %c0_0 = arith.constant 0 : index
    %c0_1 = arith.constant 0 : index
    %0 = vector.load %arg1[%c0, %c0_0, %c0_1] : memref<4x16x16xf32, #tpu.memory_space<vmem>>, vector<4x16x16xf32>
    %1 = vector.extract_strided_slice %0 {offsets = [0, 1, 0], sizes = [4, 15, 16], strides = [1, 1, 1]} : vector<4x16x16xf32> to vector<4x15x16xf32>
    %2 = vector.extract_strided_slice %0 {offsets = [0, 0, 0], sizes = [4, 15, 16], strides = [1, 1, 1]} : vector<4x16x16xf32> to vector<4x15x16xf32>
    %3 = arith.subf %1, %2 : vector<4x15x16xf32>
    %4 = arith.mulf %3, %3 : vector<4x15x16xf32>
    %cst = arith.constant dense<0.000000e+00> : vector<15x16xf32>
    %5 = vector.multi_reduction <add>, %4, %cst [0] : vector<4x15x16xf32> to vector<15x16xf32>
    %6 = vector.shape_cast %5 : vector<15x16xf32> to vector<1x15x16xf32>
    %cst_2 = arith.constant dense<0.000000e+00> : vector<1xf32>
    %7 = vector.multi_reduction <add>, %6, %cst_2 [1, 2] : vector<1x15x16xf32> to vector<1xf32>
    %8 = vector.shape_cast %7 : vector<1xf32> to vector<1x1x1xf32>
    %9 = vector.extract %8[0, 0, 0] : f32 from vector<1x1x1xf32>
    %10 = vector.extract_strided_slice %0 {offsets = [0, 0, 1], sizes = [4, 16, 15], strides = [1, 1, 1]} : vector<4x16x16xf32> to vector<4x16x15xf32>
    %11 = vector.extract_strided_slice %0 {offsets = [0, 0, 0], sizes = [4, 16, 15], strides = [1, 1, 1]} : vector<4x16x16xf32> to vector<4x16x15xf32>
    %12 = arith.subf %10, %11 : vector<4x16x15xf32>
    %13 = arith.mulf %12, %12 : vector<4x16x15xf32>
    %cst_3 = arith.constant dense<0.000000e+00> : vector<16x15xf32>
    %14 = vector.multi_reduction <add>, %13, %cst_3 [0] : vector<4x16x15xf32> to vector<16x15xf32>
    %15 = vector.shape_cast %14 : vector<16x15xf32> to vector<1x16x15xf32>
    %cst_4 = arith.constant dense<0.000000e+00> : vector<1xf32>
    %16 = vector.multi_reduction <add>, %15, %cst_4 [1, 2] : vector<1x16x15xf32> to vector<1xf32>
    %17 = vector.shape_cast %16 : vector<1xf32> to vector<1x1x1xf32>
    %18 = vector.extract %17[0, 0, 0] : f32 from vector<1x1x1xf32>
    %19 = vector.broadcast %9 : f32 to vector<1x8x128xf32>
    %c0_5 = arith.constant 0 : index
    %c0_6 = arith.constant 0 : index
    %c0_7 = arith.constant 0 : index
    %20 = vector.load %arg2[%c0_5, %c0_6, %c0_7] : memref<1x8x128xf32, #tpu.memory_space<vmem>>, vector<1x8x128xf32>
    tpu.vector_store %arg2[%c0_5, %c0_6, %c0_7], %19 {strides = array<i32>} : memref<1x8x128xf32, #tpu.memory_space<vmem>>, vector<1x8x128xf32>,
    %21 = vector.broadcast %18 : f32 to vector<1x8x128xf32>
    %c0_8 = arith.constant 0 : index
    %c0_9 = arith.constant 0 : index
    %c0_10 = arith.constant 0 : index
    %22 = vector.load %arg3[%c0_8, %c0_9, %c0_10] : memref<1x8x128xf32, #tpu.memory_space<vmem>>, vector<1x8x128xf32>
    tpu.vector_store %arg3[%c0_8, %c0_9, %c0_10], %21 {strides = array<i32>} : memref<1x8x128xf32, #tpu.memory_space<vmem>>, vector<1x8x128xf32>,
    return
  }
  func.func @transform_0(%arg0: i32) -> (i32, i32, i32) {
    %c0_i32 = arith.constant 0 : i32
    %c0_i32_0 = arith.constant 0 : i32
    %c0_i32_1 = arith.constant 0 : i32
    return %arg0, %c0_i32, %c0_i32_0 : i32, i32, i32
  }
  func.func @transform_1(%arg0: i32) -> (i32, i32, i32) {
    %c0_i32 = arith.constant 0 : i32
    %c0_i32_0 = arith.constant 0 : i32
    %c0_i32_1 = arith.constant 0 : i32
    return %arg0, %c0_i32, %c0_i32_0 : i32, i32, i32
  }
  func.func @transform_2(%arg0: i32) -> (i32, i32, i32) {
    %c0_i32 = arith.constant 0 : i32
    %c0_i32_0 = arith.constant 0 : i32
    %c0_i32_1 = arith.constant 0 : i32
    return %arg0, %c0_i32, %c0_i32_0 : i32, i32, i32
  }
}

</mosaic_0001>

<bundles_post_ra>
// kernel: tpu_custom_call.1
= control target key start
LH: loop header
LB: loop body
LE: loop exit
PB: predicated region body
PF: predicated region fallthrough
CT: control target
= control target key end

     0   :  { %8 = vsyncpa [#allocation3], 0  ;;  %s923_s0 = inlined_call_operand.hbm [shape: f32[8,16,16], index: 0, kind: input, shape index: {}]   ;;  %s924_s1 = inlined_call_operand.hbm [shape: f32[2,8,128], index: 1, kind: output, shape index: {0}]   ;;  %s925_s2 = inlined_call_operand.hbm [shape: f32[2,8,128], index: 2, kind: output, shape index: {1}]  }
   0x1   :  { %10 = vsyncpa [#allocation3 + $0x1], 0 }
   0x2   :  { %11 = vsyncpa [#allocation4], 0 }
   0x3   :  { %13 = vsyncpa [#allocation4 + $0x1], 0 }
   0x4   :  { %14 = vsyncpa [#allocation7], 0 }
   0x5   :  { %16 = vsyncpa [#allocation7 + $0x1], 0  ;;  %s712_s9 = smov 0   ;;  %s714_s10 = smov 0  }
   0x6   :  { %s716_s11 = smov 0   ;;  %s718_s12 = smov 0  }
   0x7 LB: > { %s733_s13 = sadd.s32 4294967295, %s691_s12   ;;  %s485_s14 = sadd.s32 4294967294, %s691_s12   ;;  %s691_s12 = sphi %s718_s12, %s935_s12   ;;  %s687_s11 = sphi %s716_s11, %s934_s11   ;;  %s683_s10 = sphi %s714_s10, %s933_s10   ;;  %s679_s9 = sphi %s712_s9, %s932_s9  }
   0x8   : > { %s737_s15 = sadd.s32 1, %s691_s12   ;;  %s29_s16 = sadd.s32 1, %s687_s11 }
   0x9   : > { %s26_s17 = ssub.s32 %s691_s12, %s737_s15  ;;  %p36_p0 = scmp.ne.s32.totalorder %s687_s11, %s683_s10 }
   0xa   : > { %p27_p1 = scmp.eq.s32.totalorder %s26_s17, 0  ;;  %p37_p2 = scmp.eq.s32.totalorder %s691_s12, 0 }
   0xb   : > { %p42_p3 = scmp.ne.s32.totalorder %s683_s10, %s679_s9  ;;  %p43_p4 = scmp.eq.s32.totalorder %s733_s13, 0 }
   0xc   : > { %s749_s18 = scalar_select %p27_p1, %s687_s11, %s29_s16  }
   0xd   : > { %p751_p5 = por %p37_p2, %p36_p0  ;;  %p755_p6 = por %p43_p4, %p42_p3 }
   0xe   : > { %p66_p7 = scmp.eq.s32.totalorder %s733_s13, 1  ;;  %p72_p8 = scmp.eq.s32.totalorder %s485_s14, 1 }
   0xf   : > { %p525_p10 = scmp.lt.s32.totalorder %s691_s12, 2  ;;  %s118_s23 = sand.u32 1, %s687_s11  }
  0x10   : > { %p762_p11 = por %p66_p7, %p36_p0  ;;  %p766_p12 = por %p72_p8, %p42_p3 }
  0x11   : > { %s503_s24 = sshll.u32 %s691_s12, 6  ;;  %s488_s25 = sshll.u32 %s118_s23, 6 }
  0x12   : > { %s128_s28 = scalar_lea.hbm %s923_s0, %s503_s24  ;;  %s122_s30 = scalar_lea.vmem [#allocation2], %s488_s25 }
  0x13   : > { %s129_s29 = sshll.u32 %s128_s28, 4  ;;  %s131_s3 = sshll.u32 %s122_s30, 4  ;;  %s130_s29 = int_to_ptr.hbm [resolvable:$true] %s129_s29  ;;  %s132_s3 = int_to_ptr.vmem [resolvable:$true] %s131_s3 }
  0x14   : > { %p777_p13 = pnand %p525_p10, %p751_p5  ;;  %p492_p0 = scmp.ge.s32.totalorder %s691_s12, 1 }
  0x15   : > { %p139_p1 = scmp.lt.s32.totalorder %s691_s12, 3  ;;  %s119_s5 = scalar_lea.sflag [#allocation3], %s118_s23 }
  0x16   : > { %s563_s6 = sshra.s32 %s130_s29, 4  ;;  %p567_p3 = pneg %p777_p13  ;;  %s564_s6 = int_to_ptr.hbm [resolvable:$true] %s563_s6 }
  0x17   : > { %s565_s7 = scalar_lea.hbm %s564_s6, 64  ;;  %s570_s16 = scalar_lea.hbm %s923_s0, 128 }
  0x18   : > { %p566_p2 = scmp.ne.s32.totalorder %s564_s6, %s565_s7  ;;  %p571_p5 = scmp.lt.s32.totalorder %s564_s6, %s923_s0 }
  0x19   : > { %p572_p8 = scmp.lt.s32.totalorder %s570_s16, %s565_s7 }
  0x1a   : > { %p568_p4 = pnand %p567_p3, %p566_p2 }
  0x1b   : > { %p573_p10 = por %p572_p8, %p571_p5 }
  0x1c   : > { %p569_p7 = pneg %p568_p4 }
  0x1e   : > { %p574_p9 = pnand %p573_p10, %p569_p7 }
  0x20   : > { %577 = shalt.err (!%p574_p9)
}
  0x21   : > { %s693_s23 = smov 128   ;;  %s694_s24 = smov 8  }
  0x22   : > { %517 = dma.hbm_to_vmem [thread:$0]  (!%p777_p13), %s130_s29, 1024, %s132_s3, %s119_s5, %s693_s23, %s693_s23, %s694_s24  }
  0x23   : > { %p140_p2 = pnand %p492_p0, %p139_p1 }
  0x24   : > { %s798_s25 = sand.u32 (!%p140_p2), 1, %s683_s10  }
  0x25   : > { %143 = sbr.rel (%p140_p2) target bundleno = 482 (0x1e2), region = 24  ;;  %s493_s26 = sshll.u32 (!%p140_p2), %s798_s25, 6 }
  0x26   : > { %s146_s27 = scalar_lea.sflag (!%p140_p2), [#allocation3], %s798_s25  ;;  %s149_s28 = scalar_lea.vmem (!%p140_p2), [#allocation2], %s493_s26 }
  0x2a   : > { %666 = dma.done.wait (%p755_p6), %s146_s27, 1024  }
  0x2b   : > { %668 = vsyncadd (%p755_p6), %s146_s27, 4294966272  ;;  %v806_v0 = vld [vmem:[%s149_s28 + $0x10] sm:$0xff]  ;;  %v808_v1 = vld [vmem:[%s149_s28] sm:$0xff]  ;;  %s695_s29 = smov 1   ;;  %vm307_vm0 = vcmask 130056   ;;  %s696_s20 = smov 127  }
  0x2c   : > { %271 = vrot.lane.b32.xlu1 %v806_v0, %s695_s29  ;;  %267 = vrot.lane.b32.xlu0 %v808_v1, %s695_s29  ;;  %v812_v2 = vld [vmem:[%s149_s28 + $0x20] sm:$0xff]  ;;  %v815_v3 = vld [vmem:[%s149_s28 + $0x18] sm:$0xff]  ;;  %v197_v46 = vrot.slane %v806_v0, 7  ;;  %v194_v47 = vrot.slane %v808_v1, 7  ;;  %vm193_vm1 = vcmask 1040384   ;;  %vm230_vm2 = vcmask 130049  }
  0x2d   : > { %275 = vrot.lane.b32.xlu2 %v812_v2, %s695_s29  ;;  %v817_v4 = vld [vmem:[%s149_s28 + $0x8] sm:$0xff]  ;;  %v824_v6 = vld [vmem:[%s149_s28 + $0x38] sm:$0xff]  ;;  %v826_v7 = vld [vmem:[%s149_s28 + $0x30] sm:$0xff]  ;;  %v198_v48 = vrot.slane %v815_v3, 7  ;;  %v200_v52 = vrot.slane %v812_v2, 7  ;;  %vm238_vm3 = vcmask 130048  }
  0x2e   : > { %v819_v5 = vld [vmem:[%s149_s28 + $0x28] sm:$0xff]  ;;  %v216_v49 = vsub.f32 %v806_v0, %v197_v46  ;;  %v214_v50 = vsub.f32 %v808_v1, %v194_v47  ;;  %v195_v51 = vrot.slane %v817_v4, 7  ;;  %v203_v55 = vrot.slane %v826_v7, 7  ;;  %s498_s30 = sshll.u32 %s733_s13, 3  ;;  %s494_s3 = sshll.u32 %s798_s25, 3 }
  0x2f   : > { %v201_v53 = vrot.slane %v819_v5, 7  ;;  %v199_v54 = vsel %vm193_vm1, %v197_v46, %v198_v48  ;;  %v218_v59 = vsub.f32 %v812_v2, %v200_v52  ;;  %vm248_vm4 = vcmask 1046528   ;;  %s363_s6 = scalar_lea.hbm %s924_s1, %s498_s30  ;;  %s168_s7 = scalar_lea.vmem [#allocation5], %s494_s3 }
  0x30   : > { %v224_v56 = vmul.f32 %v216_v49, %v216_v49  ;;  %v222_v57 = vmul.f32 %v214_v50, %v214_v50  ;;  %v196_v58 = vsel %vm193_vm1, %v194_v47, %v195_v51  ;;  %v217_v61 = vsub.f32 %v815_v3, %v199_v54  ;;  %s365_s8 = sshll.u32 %s168_s7, 4  ;;  %s367_s14 = sshll.u32 %s363_s6, 4  ;;  %s366_s8 = int_to_ptr.vmem [resolvable:$true] %s365_s8  ;;  %s368_s14 = int_to_ptr.hbm [resolvable:$true] %s367_s14 }
  0x31   : > { %v202_v60 = vsel %vm193_vm1, %v200_v52, %v201_v53  ;;  %v215_v62 = vsub.f32 %v817_v4, %v196_v58  ;;  %v220_v63 = vsub.f32 %v826_v7, %v203_v55  ;;  %vm255_vm5 = vcmask 129024   ;;  %s348_s17 = scalar_lea.sflag [#allocation4], %s798_s25  ;;  %s607_s19 = sshra.s32 %s368_s14, 4  ;;  %s608_s19 = int_to_ptr.hbm [resolvable:$true] %s607_s19 }
  0x32   : > { %vm330_vm6 = vcmask 121856   ;;  %s609_s23 = scalar_lea.hbm %s608_s19, 8  ;;  %s613_s26 = scalar_lea.hbm %s924_s1, 16 }
  0x33   : > { %p610_p6 = scmp.ne.s32.totalorder %s608_s19, %s609_s23  ;;  %p614_p0 = scmp.lt.s32.totalorder %s608_s19, %s924_s1 }
  0x34   : > { %273 = vrot.lane.b32.xlu1 %v815_v3, %s695_s29  ;;  %269 = vrot.lane.b32.xlu0 %v817_v4, %s695_s29  ;;  %p615_p1 = scmp.lt.s32.totalorder %s613_s26, %s609_s23 }
  0x35   : > { %277 = vrot.lane.b32.xlu2 %v819_v5, %s695_s29  ;;  %p611_p9 = pnand %p610_p6, %p762_p11 }
  0x36   : > { %p616_p3 = por %p615_p1, %p614_p0 }
  0x37   : > { %p612_p13 = pneg %p611_p9 }
  0x39   : > { %p617_p4 = pnand %p616_p3, %p612_p13 }
  0x3c   : > { %281 = vrot.lane.b32.xlu1 %v824_v6, %s695_s29  ;;  %279 = vrot.lane.b32.xlu0 %v826_v7, %s695_s29 }
  0x87   : > { %v276_v8 = vpop.permute.xlu2 %275 }
  0x88   : > { %v295_v14 = vsub.f32 %v812_v2, %v276_v8  ;;  %v226_v8 = vmul.f32 %v218_v59, %v218_v59  ;;  %v228_v2 = vmul.f32 %v220_v63, %v220_v63 }
  0x8a   : > { %v303_v24 = vmul.f32 %v295_v14, %v295_v14  ;;  %v234_v14 = vsel %vm230_vm2, %v226_v8, 0.0 }
  0x8c   : > { %v311_v34 = vsel %vm307_vm0, %v303_v24, 0.0 }
  0x8f   : > { %v278_v13 = vpop.permute.xlu2 %277 }
  0x90   : > { %v296_v17 = vsub.f32 %v819_v5, %v278_v13  ;;  %v223_v13 = vmul.f32 %v215_v62, %v215_v62 }
  0x92   : > { %v304_v25 = vmul.f32 %v296_v17, %v296_v17  ;;  %v239_v17 = vsel %vm238_vm3, %v223_v13, 0.0 }
  0x94   : > { %v318_v35 = vsel %vm307_vm0, %v304_v25, 0.0 }
  0x9e   : > { %v272_v9 = vpop.permute.xlu1 %271  ;;  %v268_v10 = vpop.permute.xlu0 %267 }
  0x9f   : > { %v293_v11 = vsub.f32 %v806_v0, %v272_v9  ;;  %v291_v12 = vsub.f32 %v808_v1, %v268_v10  ;;  %v232_v0 = vsel %vm230_vm2, %v224_v56, 0.0  ;;  %v231_v1 = vsel %vm230_vm2, %v222_v57, 0.0 }
  0xa0   : > { %v219_v9 = vsub.f32 %v819_v5, %v202_v60  ;;  %v233_v10 = vadd.f32 %v232_v0, %v231_v1 }
  0xa1   : > { %v301_v18 = vmul.f32 %v293_v11, %v293_v11  ;;  %v299_v19 = vmul.f32 %v291_v12, %v291_v12  ;;  %v204_v11 = vrot.slane %v824_v6, 7  ;;  %v225_v12 = vmul.f32 %v217_v61, %v217_v61 }
  0xa3   : > { %v309_v26 = vsel %vm307_vm0, %v301_v18, 0.0  ;;  %v308_v27 = vsel %vm307_vm0, %v299_v19, 0.0  ;;  %v240_v5 = vsel %vm238_vm3, %v225_v12, 0.0 }
  0xa4   : > { %v310_v30 = vadd.f32 %v309_v26, %v308_v27 }
  0xa6   : > { %v274_v15 = vpop.permute.xlu1 %273  ;;  %v270_v16 = vpop.permute.xlu0 %269  ;;  %v312_v40 = vadd.f32 %v311_v34, %v310_v30 }
  0xa7   : > { %v294_v20 = vsub.f32 %v815_v3, %v274_v15  ;;  %v292_v21 = vsub.f32 %v817_v4, %v270_v16  ;;  %v227_v3 = vmul.f32 %v219_v9, %v219_v9  ;;  %v205_v4 = vsel %vm193_vm1, %v203_v55, %v204_v11 }
  0xa8   : > { %v235_v15 = vadd.f32 %v234_v14, %v233_v10  ;;  %v221_v16 = vsub.f32 %v824_v6, %v205_v4 }
  0xa9   : > { %v302_v22 = vmul.f32 %v294_v20, %v294_v20  ;;  %v300_v23 = vmul.f32 %v292_v21, %v292_v21  ;;  %v242_v18 = vsel %vm238_vm3, %v227_v3, 0.0  ;;  %v241_v20 = vadd.f32 %v240_v5, %v239_v17 }
  0xaa   : > { %v229_v21 = vmul.f32 %v221_v16, %v221_v16 }
  0xab   : > { %v316_v28 = vsel %vm307_vm0, %v302_v22, 0.0  ;;  %v315_v29 = vsel %vm307_vm0, %v300_v23, 0.0  ;;  %v243_v22 = vadd.f32 %v242_v18, %v241_v20 }
  0xac   : > { %v317_v31 = vadd.f32 %v316_v28, %v315_v29  ;;  %v244_v23 = vsel %vm238_vm3, %v229_v21, 0.0 }
  0xad   : > { %v245_v24 = vadd.f32 %v244_v23, %v243_v22 }
  0xae   : > { %v282_v32 = vpop.permute.xlu1 %281  ;;  %v280_v33 = vpop.permute.xlu0 %279  ;;  %v319_v41 = vadd.f32 %v318_v35, %v317_v31 }
  0xaf   : > { %v298_v36 = vsub.f32 %v824_v6, %v282_v32  ;;  %v297_v37 = vsub.f32 %v826_v7, %v280_v33  ;;  %v236_v7 = vsel %vm230_vm2, %v228_v2, 0.0  ;;  %v250_v26 = vrot.slane %v245_v24, 1 }
  0xb0   : > { %v237_v19 = vadd.f32 %v236_v7, %v235_v15 }
  0xb1   : > { %v306_v38 = vmul.f32 %v298_v36, %v298_v36  ;;  %v305_v39 = vmul.f32 %v297_v37, %v297_v37  ;;  %v256_v28 = vsel %vm255_vm5, %v250_v26, 0.0 }
  0xb2   : > { %v249_v25 = vrot.slane %v237_v19, 1 }
  0xb3   : > { %v320_v42 = vsel %vm307_vm0, %v306_v38, 0.0  ;;  %v313_v43 = vsel %vm307_vm0, %v305_v39, 0.0 }
  0xb4   : > { %v321_v44 = vadd.f32 %v320_v42, %v319_v41  ;;  %v314_v45 = vadd.f32 %v313_v43, %v312_v40  ;;  %v251_v27 = vsel %vm248_vm4, %v249_v25, %v250_v26 }
  0xb5   : > { %v254_v6 = vsel %vm238_vm3, %v251_v27, 0.0 }
  0xb6   : > { %326 = vrot.lane.b32.xlu0 %v321_v44, %s696_s20  ;;  %324 = vrot.lane.b32.xlu2 %v314_v45, %s696_s20  ;;  %v257_v29 = vadd.f32 %v256_v28, %v254_v6 }
  0xb8   : > { %258 = vadd.xlane.f32.xlu1 %v257_v29 }
 0x110   : > { %v325_v30 = vpop.permute.xlu2 %324 }
 0x111   : > { %v331_v32 = vsel %vm330_vm6, %v325_v30, 0.0 }
 0x128   : > { %v327_v31 = vpop.permute.xlu0 %326 }
 0x129   : > { %v332_v33 = vsel %vm330_vm6, %v327_v31, 0.0 }
 0x12a   : > { %v333_v34 = vadd.f32 %v332_v33, %v331_v32 }
 0x12b   : > { %v259_v35 = vpop.xlane.xlu1 %258 }
 0x12c   : > { %334 = vadd.xlane.f32.xlu2 %v333_v34  ;;  %v260_v36 = vrot.slane %v259_v35, 4 }
 0x12e   : > { %v261_v37 = vadd.f32 %v260_v36, %v259_v35 }
 0x130   : > { %v262_v38 = vrot.slane %v261_v37, 2 }
 0x132   : > { %v263_v39 = vadd.f32 %v262_v38, %v261_v37 }
 0x134   : > { %v264_v40 = vrot.slane %v263_v39, 1 }
 0x136   : > { %v265_v41 = vadd.f32 %v264_v40, %v263_v39 }
 0x138   : > { %504 = vpush %v265_v41 }
 0x169   : > { %s505_s16 = spop %504 }
 0x16a   : > { %v343_v49 = vstv %s505_s16 }
 0x16b   : > { %344 = vst [vmem:[%s168_s7] sm:$0xff] %v343_v49 }
 0x19f   : > { %v335_v42 = vpop.xlane.xlu2 %334 }
 0x1a0   : > { %v336_v43 = vrot.slane %v335_v42, 4 }
 0x1a2   : > { %v337_v44 = vadd.f32 %v336_v43, %v335_v42 }
 0x1a4   : > { %v338_v45 = vrot.slane %v337_v44, 2 }
 0x1a6   : > { %v339_v46 = vadd.f32 %v338_v45, %v337_v44 }
 0x1a8   : > { %v340_v47 = vrot.slane %v339_v46, 1 }
 0x1aa   : > { %v341_v48 = vadd.f32 %v340_v47, %v339_v46 }
 0x1ac   : > { %506 = vpush %v341_v48 }
 0x1ad   : > { %620 = shalt.err (!%p617_p4)
}
 0x1ae   : > { %510 = dma.vmem_to_hbm [thread:$0]  (%p762_p11), %s366_s8, 128, %s368_s14, %s348_s17  }
 0x1af   : > { %s377_s4 = scalar_lea.hbm %s925_s2, %s498_s30  ;;  %s175_s5 = scalar_lea.vmem [#allocation6], %s494_s3 }
 0x1b0   : > { %s379_s6 = sshll.u32 %s175_s5, 4  ;;  %s381_s7 = sshll.u32 %s377_s4, 4  ;;  %s380_s6 = int_to_ptr.vmem [resolvable:$true] %s379_s6  ;;  %s382_s7 = int_to_ptr.hbm [resolvable:$true] %s381_s7 }
 0x1b1   : > { %s353_s19 = scalar_lea.sflag [#allocation7], %s798_s25  ;;  %s635_s23 = sshra.s32 %s382_s7, 4  ;;  %s636_s23 = int_to_ptr.hbm [resolvable:$true] %s635_s23 }
 0x1b2   : > { %s637_s13 = scalar_lea.hbm %s636_s23, 8  ;;  %s641_s30 = scalar_lea.hbm %s925_s2, 16 }
 0x1b3   : > { %p638_p7 = scmp.ne.s32.totalorder %s636_s23, %s637_s13  ;;  %p642_p10 = scmp.lt.s32.totalorder %s636_s23, %s925_s2 }
 0x1b4   : > { %p643_p2 = scmp.lt.s32.totalorder %s641_s30, %s637_s13 }
 0x1b5   : > { %p639_p5 = pnand %p638_p7, %p762_p11 }
 0x1b6   : > { %p644_p6 = por %p643_p2, %p642_p10 }
 0x1b7   : > { %p640_p8 = pneg %p639_p5 }
 0x1b9   : > { %p645_p9 = pnand %p644_p6, %p640_p8 }
 0x1dd   : > { %s507_s16 = spop %506 }
 0x1de   : > { %v345_v50 = vstv %s507_s16 }
 0x1df   : > { %346 = vst [vmem:[%s175_s5] sm:$0xff] %v345_v50 }
 0x1e0   : > { %648 = shalt.err (!%p645_p9)
}
 0x1e1   : > { %511 = dma.vmem_to_hbm [thread:$0]  (%p762_p11), %s380_s6, 128, %s382_s7, %s353_s19  }
 0x1e2 PF: > { %s393_s25 = sand.u32 1, %s679_s9   ;;  %p931_p13 = scmp.ge.s32.totalorder %s691_s12, 2 }
 0x1e3   : > { %s394_s24 = scalar_lea.sflag [#allocation4], %s393_s25 }
 0x1e4   : > { %p519_p0 = pnand %p931_p13, %p766_p12 }
 0x1e6   : > { %p520_p1 = pneg %p519_p0 }
 0x1e8   : > { %670 = dma.done.wait (%p520_p1), %s394_s24, 128  }
 0x1e9   : > { %672 = vsyncadd (%p520_p1), %s394_s24, 4294967168  ;;  %s404_s26 = scalar_lea.sflag [#allocation7], %s393_s25 }
 0x1ea   : > { %674 = dma.done.wait (%p520_p1), %s404_s26, 128  }
 0x1eb   : > { %676 = vsyncadd (%p520_p1), %s404_s26, 4294967168  ;;  %p19_p11 = scmp.ge.s32.totalorder %s737_s15, 4   ;;  %s932_s9 = smov %s683_s10 }
 0x1ec   : > { %s933_s10 = smov %s687_s11  ;;  %s934_s11 = smov %s749_s18 }
 0x1ed   : > { %s935_s12 = smov %s737_s15  ;;  %21 = sbr.rel (!%p19_p11) target bundleno = 7 (0x7), region = 86 }
 0x1f2   :  { %410 = vsyncpa [#allocation3], 1 }
 0x1f3   :  { %412 = vsyncpa [#allocation3 + $0x1], 1 }
 0x1f4   :  { %413 = vsyncpa [#allocation4], 1 }
 0x1f5   :  { %415 = vsyncpa [#allocation4 + $0x1], 1 }
 0x1f6   :  { %416 = vsyncpa [#allocation7], 1 }
 0x1f7   :  { %418 = vsyncpa [#allocation7 + $0x1], 1 }

</bundles_post_ra>
